<compile_context>
chip_gen: v7x
topology: tpu7x:2x2x1
jax: 0.10.0
libtpu: 0.0.40
codegen_flags: <defaults>
</compile_context>

<pallas_src>
import functools

import numpy as np
import jax
import jax.numpy as jnp
from jax import lax
from jax.experimental import pallas as pl
from jax.experimental.pallas import tpu as pltpu

# Criterion hyper-parameters (the module has no learnable weights).
EOS_COEF = 0.5
COST_POINT = 0.05
REG_LOSS_WEIGHT = 0.05

_TARGET_OUT_TILE_BYTES = 8 * 1024 * 1024   # kernel-1 output tile target (~8 MiB)


def _round_up(x, m):
    return ((x + m - 1) // m) * m


@functools.lru_cache(maxsize=1)
def _vmem_limit_bytes():
    """Generation-aware VMEM limit: ~60% of physical, clamped to [32, 100] MiB.

    v5e/v6e (128 MiB physical) -> ~76 MiB; v7x (64 MiB physical) -> ~38 MiB.
    """
    phys = 128 * 1024 * 1024
    try:
        info = pltpu.get_tpu_info()
        phys = int(getattr(info, "vmem_capacity_bytes", phys))
    except Exception:
        pass
    return int(min(100 * 1024 * 1024, max(32 * 1024 * 1024, phys * 0.6)))


# --------------------------------------------------------------------------- #
# Kernel 1: transposed block-diagonal matching cost
#   C_T[b, j, i] = cost_point * ||coords[b,i] - targets_b[j]|| - sigmoid(logit[b,i])
# Layout: targets on sublanes (T_pad rows), points lane-dense (TM columns).
# --------------------------------------------------------------------------- #
def _cost_kernel(targets_ref, coords_ref, logits_ref, c_ref, *, cost_point):
    # targets_ref: (T_pad, 2) resident per image; coords_ref: (2, TM) lane-dense;
    # logits_ref:  (1, TM) raw logits; c_ref: (T_pad, TM).
    tx = targets_ref[:, 0:1]                   # (T_pad, 1)
    ty = targets_ref[:, 1:2]                   # (T_pad, 1)
    cx = coords_ref[0:1, :]                    # (1, TM)
    cy = coords_ref[1:2, :]                    # (1, TM)
    dx = cx - tx                               # (T_pad, TM)
    dy = cy - ty
    dist = jnp.sqrt(dx * dx + dy * dy)         # torch.cdist(coords, targets, p=2)^T
    prob = jax.nn.sigmoid(logits_ref[...])     # (1, TM) — EUP logistic, lane-dense
    c_ref[...] = cost_point * dist - prob


def compute_cost_matrix(targets_pad, coords_t, logits_t, *, tm):
    # targets_pad: (B, T_pad, 2); coords_t: (B, 2, rows_pad); logits_t: (B, 1, rows_pad)
    B, t_pad, _ = targets_pad.shape
    rows_pad = coords_t.shape[2]
    kernel = functools.partial(_cost_kernel, cost_point=COST_POINT)
    # NOTE: f32 output kept for Hungarian tie stability.
    # TODO(synk): optional bf16 output would halve HBM write + D2H bytes but can
    # flip near-tie assignments.
    return pl.pallas_call(
        kernel,
        out_shape=jax.ShapeDtypeStruct((B, t_pad, rows_pad), jnp.float32),
        grid_spec=pltpu.PrefetchScalarGridSpec(
            num_scalar_prefetch=0,
            grid=(B, rows_pad // tm),
            in_specs=[
                pl.BlockSpec((None, t_pad, 2), lambda b, i: (b, 0, 0)),   # resident
                pl.BlockSpec((None, 2, tm), lambda b, i: (b, 0, i)),
                pl.BlockSpec((None, 1, tm), lambda b, i: (b, 0, i)),
            ],
            out_specs=pl.BlockSpec((None, t_pad, tm), lambda b, i: (b, 0, i)),
        ),
        compiler_params=pltpu.CompilerParams(
            dimension_semantics=("parallel", "parallel"),
            vmem_limit_bytes=_vmem_limit_bytes(),
        ),
    )(targets_pad, coords_t, logits_t)


# --------------------------------------------------------------------------- #
# Kernel 2: total loss = weighted CE over all real points + matched L2 regression
#   log(sigmoid(x)) = -softplus(-x) ;  log(1 - sigmoid(x)) = -softplus(x)
#   CE*M = eos*sum_{valid} softplus(x) + sum_{matched}[softplus(-x) - eos*softplus(x)]
# Only the raw logits are streamed; validity mask is built in-kernel from iota.
# M and K are runtime SMEM scalars (scalar prefetch) -> no per-batch recompiles.
# --------------------------------------------------------------------------- #
def _loss_kernel(scal_ref, logits_ref, mlog_ref, pred_ref, tgt_ref, out_ref, acc_ref,
                 *, eos_coef, reg_w, tr):
    i = pl.program_id(0)

    @pl.when(i == 0)
    def _():
        acc_ref[...] = jnp.zeros_like(acc_ref)

    # Streamed negative-style term over all valid points.
    x = logits_ref[...]                                             # (TR, 128)
    row = lax.broadcasted_iota(jnp.int32, (tr, 128), 0)
    lane = lax.broadcasted_iota(jnp.int32, (tr, 128), 1)
    gidx = (i * tr + row) * 128 + lane
    valid = (gidx < scal_ref[0]).astype(jnp.float32)                # flat index < M
    sp_pos = jnp.maximum(x, 0.0) + jnp.log(1.0 + jnp.exp(-jnp.abs(x)))   # softplus(x)
    contrib = eos_coef * (valid * sp_pos)                           # (TR, 128), VPU/EUP only
    # Lane/sublane-dense partial sums; the single cross-lane reduce happens once,
    # in the epilogue (no per-step XLU reduction, no 1-element serial dependency).
    acc_ref[...] += jnp.sum(contrib.reshape(tr // 8, 8, 128), axis=0)

    @pl.when(i == pl.num_programs(0) - 1)
    def _():
        m_f = scal_ref[0].astype(jnp.float32)
        k = scal_ref[1]
        div = jnp.maximum(k, 1).astype(jnp.float32)

        # Matched-positive correction: + softplus(-x) - eos*softplus(x) per match.
        xm = mlog_ref[...]                                          # (1, K_pad)
        kmask = (lax.broadcasted_iota(jnp.int32, xm.shape, 1) < k).astype(jnp.float32)
        lt = jnp.log(1.0 + jnp.exp(-jnp.abs(xm)))
        sp_neg_m = jnp.maximum(-xm, 0.0) + lt                       # -log(p)
        sp_pos_m = jnp.maximum(xm, 0.0) + lt                        # -log(1-p)
        pos_corr = jnp.sum(kmask * (sp_neg_m - eos_coef * sp_pos_m), keepdims=True)  # (1,1)

        ce = (jnp.sum(acc_ref[...], keepdims=True) + pos_corr) / m_f                 # (1,1)

        d = pred_ref[...] - tgt_ref[...]                            # (2, K_pad); pads are 0
        dist = jnp.sqrt(jnp.sum(d * d, axis=0, keepdims=True))      # (1, K_pad)
        mse = jnp.sum(dist, keepdims=True) / div                    # (1,1)

        out_ref[...] = (ce + reg_w * mse).astype(jnp.float32)


def criterion_loss(scalars, logits_2d, mlog, pred_t, tgt_t, *, tr):
    r_pad = logits_2d.shape[0]
    k_pad = mlog.shape[1]
    kernel = functools.partial(_loss_kernel, eos_coef=EOS_COEF,
                               reg_w=REG_LOSS_WEIGHT, tr=tr)
    # TODO(synk): on v7x with very large M (>~1M points) this single "arbitrary"
    # axis uses one TensorCore; a leading size-2 "parallel" axis with per-core
    # partials would shard it. Not worth it at typical p2pnet sizes.
    out = pl.pallas_call(
        kernel,
        out_shape=jax.ShapeDtypeStruct((1, 1), jnp.float32),
        grid_spec=pltpu.PrefetchScalarGridSpec(
            num_scalar_prefetch=1,
            grid=(r_pad // tr,),
            in_specs=[
                pl.BlockSpec((tr, 128), lambda i, s: (i, 0)),        # streamed logits
                pl.BlockSpec((1, k_pad), lambda i, s: (0, 0)),       # matched logits (resident)
                pl.BlockSpec((2, k_pad), lambda i, s: (0, 0)),       # matched pred (resident)
                pl.BlockSpec((2, k_pad), lambda i, s: (0, 0)),       # matched tgt (resident)
            ],
            out_specs=pl.BlockSpec((1, 1), lambda i, s: (0, 0)),
            scratch_shapes=[pltpu.VMEM((8, 128), jnp.float32)],
        ),
        compiler_params=pltpu.CompilerParams(
            dimension_semantics=("arbitrary",),
            vmem_limit_bytes=_vmem_limit_bytes(),
        ),
    )(scalars, logits_2d, mlog, pred_t, tgt_t)
    return out[0, 0]


# --------------------------------------------------------------------------- #
# Host-side Hungarian (rectangular linear_sum_assignment, scipy-equivalent)
# --------------------------------------------------------------------------- #
def _linear_sum_assignment(cost):
    cost = np.asarray(cost, dtype=np.float64)
    nr, nc = cost.shape
    transposed = False
    if nr > nc:
        cost = cost.T.copy()
        nr, nc = cost.shape
        transposed = True
    u = np.zeros(nr)
    v = np.zeros(nc)
    col4row = np.full(nr, -1, dtype=np.int64)
    row4col = np.full(nc, -1, dtype=np.int64)
    path = np.full(nc, -1, dtype=np.int64)

    for cur_row in range(nr):
        shortest = np.full(nc, np.inf)
        SR = np.zeros(nr, dtype=bool)
        SC = np.zeros(nc, dtype=bool)
        remaining = [nc - it - 1 for it in range(nc)]
        min_val = 0.0
        i = cur_row
        sink = -1
        while sink == -1:
            index = -1
            lowest = np.inf
            SR[i] = True
            for it, j in enumerate(remaining):
                r = min_val + cost[i, j] - u[i] - v[j]
                if r < shortest[j]:
                    path[j] = i
                    shortest[j] = r
                if shortest[j] < lowest or (shortest[j] == lowest and row4col[j] == -1):
                    lowest = shortest[j]
                    index = it
            min_val = lowest
            if not np.isfinite(min_val):
                raise ValueError("infeasible cost matrix")
            j = remaining[index]
            if row4col[j] == -1:
                sink = j
            else:
                i = row4col[j]
            SC[j] = True
            remaining[index] = remaining[-1]
            remaining.pop()
        u[cur_row] += min_val
        for k in range(nr):
            if SR[k] and k != cur_row:
                u[k] += min_val - shortest[col4row[k]]
        for j in range(nc):
            if SC[j]:
                v[j] -= min_val - shortest[j]
        j = sink
        while True:
            k = path[j]
            row4col[j] = k
            col4row[k], j = j, col4row[k]
            if k == cur_row:
                break

    if transposed:
        order = np.argsort(col4row)
        return col4row[order], order
    return np.arange(nr, dtype=np.int64), col4row


# --------------------------------------------------------------------------- #
# Glue: flattern_predictions + Criterion.forward
# --------------------------------------------------------------------------- #
def criterion_forward(preds, targets_list):
    coords_nchw = preds['coords'].astype(jnp.float32)   # (B, 2A, H, W)
    logits_nchw = preds['logits'].astype(jnp.float32)   # (B,  A, H, W)
    B, two_a, H, W = coords_nchw.shape
    A = two_a // 2
    n_points = A * H * W
    M = B * n_points

    # Point-list layout; sigmoid is fused into the kernels (raw logits passed through).
    coords_b = jnp.transpose(coords_nchw.reshape(B, A, 2, H, W), (0, 1, 3, 4, 2))
    coords_b = coords_b.reshape(B, n_points, 2)                     # (B, n_points, 2)
    logits_b = logits_nchw.reshape(B, n_points)                     # (B, n_points) raw

    # Per-image targets padded on the sublane axis (multiple of 8 only — the point
    # axis, not the target axis, is lane-dense now).
    nt_list = [int(t.shape[0]) for t in targets_list]
    T_pad = _round_up(max(max(nt_list), 1), 8)
    targets_np = np.zeros((B, T_pad, 2), np.float32)
    for b, t in enumerate(targets_list):
        tnp = np.asarray(jax.device_get(t), np.float32).reshape(-1, 2)
        if tnp.shape[0]:
            targets_np[b, :tnp.shape[0], :] = tnp
    targets_pad = jnp.asarray(targets_np)

    # Row (=point) tiling for kernel 1: lane-dense, output tile targeted at ~8 MiB
    # (double-buffered it stays well inside the generation-aware VMEM limit).
    tm_cap = max(128, min(65536, (_TARGET_OUT_TILE_BYTES // (4 * T_pad)) // 128 * 128))
    rows_pad = _round_up(n_points, 128)
    TM = min(tm_cap, rows_pad)
    rows_pad = _round_up(rows_pad, TM)
    pad_r = rows_pad - n_points

    coords_t = jnp.pad(jnp.transpose(coords_b, (0, 2, 1)),
                       ((0, 0), (0, 0), (0, pad_r)))                # (B, 2, rows_pad)
    logits_t = jnp.pad(logits_b, ((0, 0), (0, pad_r)))[:, None, :]  # (B, 1, rows_pad)

    # Pallas kernel 1: transposed block-diagonal matching cost blocks.
    C = compute_cost_matrix(targets_pad, coords_t, logits_t, tm=TM)  # (B, T_pad, rows_pad)

    # TODO(synk): Hungarian assignment (linear_sum_assignment) is a sequential
    # combinatorial algorithm with no Pallas equivalent; it runs on host in numpy.
    # Only the useful per-image block is transferred, and D2H copies are started
    # asynchronously so they overlap with the matching of earlier images.
    slices = []
    for b, nt in enumerate(nt_list):
        if nt == 0:
            slices.append(None)
            continue
        s = C[b, :nt, :n_points]                                    # (nt, n_points)
        if hasattr(s, "copy_to_host_async"):
            s.copy_to_host_async()
        slices.append(s)

    matched = []
    shift = 0
    for b, nt in enumerate(nt_list):
        if nt == 0:
            continue
        ct = np.asarray(jax.device_get(slices[b]))                  # rows=targets, cols=points
        t_rows, p_cols = _linear_sum_assignment(ct)
        lsa = np.stack([p_cols, t_rows], axis=1).astype(np.int64)   # (point_idx, target_idx)
        lsa[:, 0] += b * n_points
        lsa[:, 1] += shift
        shift += lsa.shape[0]
        matched.append(lsa)
    matched = np.concatenate(matched, axis=0) if matched else np.zeros((0, 2), np.int64)

    # Kernel-2 inputs: vreg-dense (rows, 128) logits, tiny (1/2, K_pad) matched arrays.
    R_raw = (M + 127) // 128
    rows2 = _round_up(max(R_raw, 1), 8)
    TR = min(2048, rows2)
    R_pad = _round_up(rows2, TR)
    M_pad = R_pad * 128

    logits_flat = logits_b.reshape(M)
    logits_2d = jnp.pad(logits_flat, (0, M_pad - M)).reshape(R_pad, 128)

    K = int(matched.shape[0])
    K_pad = _round_up(max(K, 1), 128)
    mlog = jnp.zeros((1, K_pad), jnp.float32)
    pred_t = jnp.zeros((2, K_pad), jnp.float32)     # pads: pred == tgt == 0 -> dist 0
    tgt_t = jnp.zeros((2, K_pad), jnp.float32)
    if K > 0:
        pt_idx = jnp.asarray(matched[:, 0], jnp.int32)
        tg_idx = jnp.asarray(matched[:, 1], jnp.int32)
        coords_flat = coords_b.reshape(M, 2)
        targets_cat = jnp.concatenate(
            [jnp.asarray(t, jnp.float32).reshape(-1, 2) for t in targets_list], axis=0)
        mlog = mlog.at[0, :K].set(jnp.take(logits_flat, pt_idx, axis=0))
        pred_t = pred_t.at[:, :K].set(jnp.take(coords_flat, pt_idx, axis=0).T)
        tgt_t = tgt_t.at[:, :K].set(jnp.take(targets_cat, tg_idx, axis=0).T)

    scalars = jnp.asarray([M, K], jnp.int32)        # runtime SMEM scalars (no recompile)

    # Pallas kernel 2: ce + reg_loss_weight * mse.
    return criterion_loss(scalars, logits_2d, mlog, pred_t, tgt_t, tr=TR)


if __name__ == "__main__":
    key = jax.random.PRNGKey(0)
    k1, k2, k3, k4 = jax.random.split(key, 4)
    B, A, H, W = 2, 2, 4, 4                       # -> n_points = 32, M = 64
    coords_pred = jax.random.uniform(k1, (B, 2 * A, H, W), jnp.float32) * 16.0
    logits_pred = jax.random.normal(k2, (B, A, H, W), jnp.float32)
    targets = [jax.random.uniform(k3, (3, 2), jnp.float32) * 16.0,
               jax.random.uniform(k4, (5, 2), jnp.float32) * 16.0]

    loss = criterion_forward({'coords': coords_pred, 'logits': logits_pred}, targets)
    loss = jax.block_until_ready(loss)
    assert bool(jnp.isfinite(loss))
    print("KERNEL_OK")
</pallas_src>

<mosaic_0001>
module attributes {stable_mosaic.version = 11 : i64} {
  func.func @_cost_kernel(%arg0: i32, %arg1: i32, %arg2: memref<1x8x2xf32, #tpu.memory_space<vmem>>, %arg3: memref<1x2x128xf32, #tpu.memory_space<vmem>>, %arg4: memref<1x1x128xf32, #tpu.memory_space<vmem>>, %arg5: memref<1x8x128xf32, #tpu.memory_space<vmem>>) attributes {dimension_semantics = [#tpu.dimension_semantics<parallel>, #tpu.dimension_semantics<parallel>], iteration_bounds = array<i64: 2, 1>, scalar_prefetch = 0 : i64, scratch_operands = 0 : i64, tpu.core_type = #tpu.core_type<tc>, window_params = [{transform_indices = @transform_0, window_bounds = array<i64: 1, 8, 2>}, {transform_indices = @transform_1, window_bounds = array<i64: 1, 2, 128>}, {transform_indices = @transform_2, window_bounds = array<i64: 1, 1, 128>}, {transform_indices = @transform_3, window_bounds = array<i64: 1, 8, 128>}]} {
    %c0 = arith.constant 0 : index
    %c0_0 = arith.constant 0 : index
    %c0_1 = arith.constant 0 : index
    %0 = vector.load %arg2[%c0, %c0_0, %c0_1] : memref<1x8x2xf32, #tpu.memory_space<vmem>>, vector<1x8x1xf32>
    %1 = vector.shape_cast %0 : vector<1x8x1xf32> to vector<8x1xf32>
    %c0_2 = arith.constant 0 : index
    %c0_3 = arith.constant 0 : index
    %c1 = arith.constant 1 : index
    %2 = vector.load %arg2[%c0_2, %c0_3, %c1] : memref<1x8x2xf32, #tpu.memory_space<vmem>>, vector<1x8x1xf32>
    %3 = vector.shape_cast %2 : vector<1x8x1xf32> to vector<8x1xf32>
    %c0_4 = arith.constant 0 : index
    %c0_5 = arith.constant 0 : index
    %c0_6 = arith.constant 0 : index
    %4 = vector.load %arg3[%c0_4, %c0_5, %c0_6] : memref<1x2x128xf32, #tpu.memory_space<vmem>>, vector<1x1x128xf32>
    %5 = vector.shape_cast %4 : vector<1x1x128xf32> to vector<1x128xf32>
    %c0_7 = arith.constant 0 : index
    %c1_8 = arith.constant 1 : index
    %c0_9 = arith.constant 0 : index
    %6 = vector.load %arg3[%c0_7, %c1_8, %c0_9] : memref<1x2x128xf32, #tpu.memory_space<vmem>>, vector<1x1x128xf32>
    %7 = vector.shape_cast %6 : vector<1x1x128xf32> to vector<1x128xf32>
    %8 = vector.broadcast %5 : vector<1x128xf32> to vector<8x128xf32>
    %9 = vector.broadcast %1 : vector<8x1xf32> to vector<8x128xf32>
    %10 = arith.subf %8, %9 : vector<8x128xf32>
    %11 = vector.broadcast %7 : vector<1x128xf32> to vector<8x128xf32>
    %12 = vector.broadcast %3 : vector<8x1xf32> to vector<8x128xf32>
    %13 = arith.subf %11, %12 : vector<8x128xf32>
    %14 = arith.mulf %10, %10 : vector<8x128xf32>
    %15 = arith.mulf %13, %13 : vector<8x128xf32>
    %16 = arith.addf %14, %15 : vector<8x128xf32>
    %17 = math.sqrt %16 : vector<8x128xf32>
    %c0_10 = arith.constant 0 : index
    %c0_11 = arith.constant 0 : index
    %c0_12 = arith.constant 0 : index
    %18 = vector.load %arg4[%c0_10, %c0_11, %c0_12] : memref<1x1x128xf32, #tpu.memory_space<vmem>>, vector<1x1x128xf32>
    %19 = vector.shape_cast %18 : vector<1x1x128xf32> to vector<1x128xf32>
    %20 = arith.negf %19 : vector<1x128xf32>
    %21 = math.exp %20 : vector<1x128xf32>
    %cst = arith.constant 1.000000e+00 : f32
    %22 = vector.broadcast %cst : f32 to vector<1x128xf32>
    %23 = arith.addf %22, %21 : vector<1x128xf32>
    %24 = arith.divf %22, %23 : vector<1x128xf32>
    %cst_13 = arith.constant 5.000000e-02 : f32
    %25 = vector.broadcast %cst_13 : f32 to vector<8x128xf32>
    %26 = arith.mulf %25, %17 : vector<8x128xf32>
    %27 = vector.broadcast %24 : vector<1x128xf32> to vector<8x128xf32>
    %28 = arith.subf %26, %27 : vector<8x128xf32>
    %c0_14 = arith.constant 0 : index
    %c0_15 = arith.constant 0 : index
    %c0_16 = arith.constant 0 : index
    %29 = vector.load %arg5[%c0_14, %c0_15, %c0_16] : memref<1x8x128xf32, #tpu.memory_space<vmem>>, vector<1x8x128xf32>
    %30 = vector.shape_cast %29 : vector<1x8x128xf32> to vector<8x128xf32>
    %31 = vector.shape_cast %28 : vector<8x128xf32> to vector<1x8x128xf32>
    tpu.vector_store %arg5[%c0_14, %c0_15, %c0_16], %31 {strides = array<i32>} : memref<1x8x128xf32, #tpu.memory_space<vmem>>, vector<1x8x128xf32>,
    return
  }
  func.func @transform_0(%arg0: i32, %arg1: i32) -> (i32, i32, i32) {
    %c0_i32 = arith.constant 0 : i32
    %c0_i32_0 = arith.constant 0 : i32
    %c0_i32_1 = arith.constant 0 : i32
    return %arg0, %c0_i32, %c0_i32_0 : i32, i32, i32
  }
  func.func @transform_1(%arg0: i32, %arg1: i32) -> (i32, i32, i32) {
    %c0_i32 = arith.constant 0 : i32
    %c0_i32_0 = arith.constant 0 : i32
    return %arg0, %c0_i32, %arg1 : i32, i32, i32
  }
  func.func @transform_2(%arg0: i32, %arg1: i32) -> (i32, i32, i32) {
    %c0_i32 = arith.constant 0 : i32
    %c0_i32_0 = arith.constant 0 : i32
    return %arg0, %c0_i32, %arg1 : i32, i32, i32
  }
  func.func @transform_3(%arg0: i32, %arg1: i32) -> (i32, i32, i32) {
    %c0_i32 = arith.constant 0 : i32
    %c0_i32_0 = arith.constant 0 : i32
    return %arg0, %c0_i32, %arg1 : i32, i32, i32
  }
}

</mosaic_0001>

<bundles_post_ra>
// kernel: tpu_custom_call.1
= control target key start
LH: loop header
LB: loop body
LE: loop exit
PB: predicated region body
PF: predicated region fallthrough
CT: control target
= control target key end

     0   :  { %s1024_s0 = inlined_call_operand.hbm [shape: f32[2,8,2], index: 0, kind: input, shape index: {}]   ;;  %s1025_s1 = inlined_call_operand.hbm [shape: f32[2,2,128], index: 1, kind: input, shape index: {}]   ;;  %s1026_s2 = inlined_call_operand.hbm [shape: f32[2,1,128], index: 2, kind: input, shape index: {}]   ;;  %s1027_s3 = inlined_call_operand.hbm [shape: f32[2,8,128], index: 3, kind: output, shape index: {}]  }
   0x1   :  { %1032 = sst [smem:[#allocation13_spill]] %s1025_s1 }
   0x2   :  { %8 = vsyncpa [#allocation3], 0 }
   0x3   :  { %10 = vsyncpa [#allocation3 + $0x1], 0 }
   0x4   :  { %11 = vsyncpa [#allocation6], 0 }
   0x5   :  { %13 = vsyncpa [#allocation6 + $0x1], 0 }
   0x6   :  { %14 = vsyncpa [#allocation4], 0 }
   0x7   :  { %16 = vsyncpa [#allocation4 + $0x1], 0  ;;  %s764_s12 = smov 0   ;;  %s766_s13 = smov 0  }
   0x8   :  { %s768_s14 = smov 0   ;;  %s770_s15 = smov 0  }
   0x9   :  { %s772_s16 = smov 0   ;;  %s774_s17 = smov 0  }
   0xa LB: > { %s795_s18 = sadd.s32 4294967295, %s736_s17   ;;  %s459_s19 = sadd.s32 4294967294, %s736_s17   ;;  %s736_s17 = sphi %s774_s17, %s22_s17   ;;  %s732_s16 = sphi %s772_s16, %s1055_s16   ;;  %s728_s15 = sphi %s770_s15, %s1054_s15   ;;  %s724_s14 = sphi %s768_s14, %s1053_s14   ;;  %s720_s13 = sphi %s766_s13, %s1052_s13   ;;  %s716_s12 = sphi %s764_s12, %s1051_s12  }
   0xb   : > { %s34_s20 = sadd.s32 1, %s732_s16  ;;  %s41_s21 = sadd.s32 1, %s724_s14 }
   0xc   : > { %p36_p0 = scmp.ge.s32.totalorder %s34_s20, 2  ;;  %p48_p1 = scmp.ne.s32.totalorder %s724_s14, %s720_s13 }
   0xd   : > { %p49_p2 = scmp.eq.s32.totalorder %s736_s17, 0  ;;  %p54_p3 = scmp.ne.s32.totalorder %s720_s13, %s716_s12 }
   0xe   : > { %s1057_s20 = smov (%p36_p0, %s34_s20), 0  ;;  %p55_p5 = scmp.eq.s32.totalorder %s795_s18, 0 }
   0xf   : > { %1033 = sst [smem:[#allocation12_spill]] %s1057_s20  ;;  %p807_p4 = por %p49_p2, %p48_p1 }
  0x10   : > { %s38_s23 = ssub.s32 %s732_s16, %s1057_s20  ;;  %p136_p6 = scmp.eq.s32.totalorder %s795_s18, 1 }
  0x11   : > { %p39_p7 = scmp.eq.s32.totalorder %s38_s23, 0  ;;  %p815_p8 = por %p55_p5, %p54_p3 }
  0x12   : > { %p819_p9 = por %p136_p6, %p48_p1  ;;  %p142_p10 = scmp.eq.s32.totalorder %s459_s19, 1 }
  0x13   : > { %s1035_s24 = scalar_select %p815_p8, 1, 0 }
  0x14   : > { %s1036_s25 = scalar_select %p819_p9, 1, 0 }
  0x15   : > { %s824_s26 = scalar_select %p39_p7, %s724_s14, %s41_s21  }
  0x16   : > { %p826_p11 = por %p142_p10, %p54_p3  ;;  %p500_p13 = scmp.lt.s32.totalorder %s736_s17, 2 }
  0x17   : > { %s833_s28 = sand.u32 1, %s724_s14   ;;  %s180_s29 = sand.u32 1, %s736_s17  }
  0x18   : > { %s1037_s27 = scalar_select %p826_p11, 1, 0 }
  0x19   : > { %s464_s30 = sshll.u32 %s833_s28, 1  ;;  %p839_p0 = pnand %p500_p13, %p807_p4 }
  0x1a   : > { %s465_s5 = sshll.u32 %s732_s16, 5  ;;  %s1039_s1 = sld [smem:[#allocation13_spill]] }
  0x1b   : > { %s1038_s4 = scalar_select %p839_p0, 1, 0 }
  0x1c   : > { %s184_s9 = scalar_lea.vmem [#allocation5], %s464_s30  ;;  %s853_s11 = scalar_lea.sflag [#allocation6], %s180_s29 }
  0x1d   : > { %s192_s10 = sshll.u32 %s184_s9, 4  ;;  %p859_p4 = pneg %p839_p0  ;;  %s850_s10 = int_to_ptr.vmem [resolvable:$true] %s192_s10 }
  0x20   : > { %s847_s8 = scalar_lea.hbm %s1039_s1, %s465_s5  ;;  %s565_s30 = scalar_lea.hbm %s1039_s1, 64 }
  0x21   : > { %s560_s19 = scalar_lea.hbm %s847_s8, 32  ;;  %p566_p7 = scmp.lt.u32.totalorder %s847_s8, %s1039_s1 }
  0x22   : > { %p561_p3 = scmp.ne.s32.totalorder %s847_s8, %s560_s19  ;;  %p567_p10 = scmp.lt.u32.totalorder %s565_s30, %s560_s19 }
  0x23   : > { %p569_p12 = scmp.lt.u32.totalorder %s560_s19, %s847_s8 }
  0x24   : > { %p563_p5 = pnand %p859_p4, %p561_p3  ;;  %p568_p13 = por %p567_p10, %p566_p7 }
  0x26   : > { %p564_p6 = pneg %p563_p5  ;;  %p570_p1 = por %p569_p12, %p568_p13 }
  0x28   : > { %p571_p2 = pnand %p570_p1, %p564_p6 }
  0x2a   : > { %574 = shalt.err (!%p571_p2)
}
  0x2b   : > { %s575_s29 = scalar_lea.vmem %s850_s10, 32  ;;  %s738_s7 = smov [#allocation5]  }
  0x2c   : > { %p576_p3 = scmp.ne.s32.totalorder %s850_s10, %s575_s29  ;;  %s580_s9 = sshll.u32 %s738_s7, 4  ;;  %s581_s9 = int_to_ptr.vmem [resolvable:$false] %s580_s9 }
  0x2d   : > { %s582_s22 = scalar_lea.vmem %s581_s9, 64  ;;  %p583_p9 = scmp.lt.s32.totalorder %s850_s10, %s581_s9 }
  0x2e   : > { %p578_p5 = pnand %p576_p3, %p859_p4  ;;  %p584_p8 = scmp.lt.s32.totalorder %s582_s22, %s575_s29 }
  0x30   : > { %p579_p11 = pneg %p578_p5  ;;  %p585_p7 = por %p584_p8, %p583_p9 }
  0x32   : > { %p586_p10 = pnand %p585_p7, %p579_p11 }
  0x34   : > { %589 = shalt.err (!%p586_p10)
}
  0x35   : > { %492 = dma.hbm_to_vmem [thread:$0]  (!%p839_p0), %s847_s8, 32, %s850_s10, %s853_s11  }
  0x36   : > { %p1041_p12 = scmp.lt.s32.totalorder %s736_s17, 3  ;;  %p1042_p1 = scmp.ge.s32.totalorder %s736_s17, 1 }
  0x37   : > { %s462_s23 = sshll.u32 %s833_s28, 3  ;;  %s463_s30 = sshll.u32 %s732_s16, 7 }
  0x38   : > { %p887_p2 = pnand %p1042_p1, %p1041_p12  ;;  %s896_s29 = scalar_lea.hbm %s1024_s0, %s463_s30 }
  0x39   : > { %s166_s7 = scalar_lea.vmem [#allocation2], %s462_s23  ;;  %s466_s8 = sshll.u32 %s732_s16, 4 }
  0x3a   : > { %s1043_s19 = scalar_select %p887_p2, 1, 0 }
  0x3b   : > { %s173_s9 = sshll.u32 %s166_s7, 4  ;;  %s163_s10 = scalar_lea.sflag [#allocation3], %s833_s28  ;;  %s898_s9 = int_to_ptr.vmem [resolvable:$true] %s173_s9 }
  0x3c   : > { %s590_s22 = scalar_lea.hbm %s896_s29, 128  ;;  %s595_s30 = scalar_lea.hbm %s1024_s0, 256 }
  0x3d   : > { %p591_p8 = scmp.ne.s32.totalorder %s896_s29, %s590_s22  ;;  %p596_p6 = scmp.lt.u32.totalorder %s896_s29, %s1024_s0 }
  0x3e   : > { %p597_p13 = scmp.lt.u32.totalorder %s595_s30, %s590_s22  ;;  %p599_p5 = scmp.lt.u32.totalorder %s590_s22, %s896_s29 }
  0x3f   : > { %p593_p9 = pnand %p591_p8, %p859_p4 }
  0x40   : > { %p598_p3 = por %p597_p13, %p596_p6 }
  0x41   : > { %p594_p11 = pneg %p593_p9 }
  0x42   : > { %p600_p7 = por %p599_p5, %p598_p3 }
  0x44   : > { %p601_p10 = pnand %p600_p7, %p594_p11 }
  0x46   : > { %604 = shalt.err (!%p601_p10)
}
  0x47   : > { %s605_s23 = scalar_lea.vmem %s898_s9, 128  ;;  %s739_s1 = smov [#allocation2]  }
  0x48   : > { %p606_p12 = scmp.ne.s32.totalorder %s898_s9, %s605_s23  ;;  %s610_s20 = sshll.u32 %s739_s1, 4  ;;  %s611_s20 = int_to_ptr.vmem [resolvable:$false] %s610_s20 }
  0x49   : > { %s612_s7 = scalar_lea.vmem %s611_s20, 256  ;;  %p613_p9 = scmp.lt.s32.totalorder %s898_s9, %s611_s20 }
  0x4a   : > { %p608_p1 = pnand %p606_p12, %p859_p4  ;;  %p614_p2 = scmp.lt.s32.totalorder %s612_s7, %s605_s23 }
  0x4c   : > { %p609_p8 = pneg %p608_p1  ;;  %p615_p6 = por %p614_p2, %p613_p9 }
  0x4e   : > { %p616_p13 = pnand %p615_p6, %p609_p8 }
  0x50   : > { %619 = shalt.err (!%p616_p13)
}
  0x51   : > { %489 = dma.hbm_to_vmem [thread:$0]  (!%p839_p0), %s896_s29, 128, %s898_s9, %s163_s10  }
  0x52   : > { %s928_s5 = scalar_lea.hbm %s1026_s2, %s466_s8  ;;  %s202_s6 = scalar_lea.vmem [#allocation7], %s833_s28 }
  0x53   : > { %s210_s23 = sshll.u32 %s202_s6, 4  ;;  %s620_s1 = scalar_lea.hbm %s928_s5, 16  ;;  %s211_s23 = int_to_ptr.vmem [resolvable:$true] %s210_s23 }
  0x54   : > { %p621_p2 = scmp.ne.s32.totalorder %s928_s5, %s620_s1  ;;  %s625_s9 = scalar_lea.hbm %s1026_s2, 32 }
  0x55   : > { %p626_p5 = scmp.lt.u32.totalorder %s928_s5, %s1026_s2  ;;  %p627_p7 = scmp.lt.u32.totalorder %s625_s9, %s620_s1 }
  0x56   : > { %p623_p11 = pnand %p621_p2, %p859_p4  ;;  %p629_p12 = scmp.lt.u32.totalorder %s620_s1, %s928_s5 }
  0x57   : > { %p628_p10 = por %p627_p7, %p626_p5 }
  0x58   : > { %p624_p3 = pneg %p623_p11 }
  0x59   : > { %p630_p1 = por %p629_p12, %p628_p10 }
  0x5b   : > { %p631_p8 = pnand %p630_p1, %p624_p3 }
  0x5d   : > { %634 = shalt.err (!%p631_p8)
}
  0x5e   : > { %s635_s28 = scalar_lea.vmem %s211_s23, 16  ;;  %s740_s8 = smov [#allocation7]  }
  0x5f   : > { %p636_p9 = scmp.ne.s32.totalorder %s211_s23, %s635_s28  ;;  %s640_s22 = sshll.u32 %s740_s8, 4  ;;  %s641_s22 = int_to_ptr.vmem [resolvable:$false] %s640_s22 }
  0x60   : > { %s642_s30 = scalar_lea.vmem %s641_s22, 32  ;;  %p643_p2 = scmp.lt.s32.totalorder %s211_s23, %s641_s22 }
  0x61   : > { %p638_p6 = pnand %p636_p9, %p859_p4  ;;  %p644_p11 = scmp.lt.s32.totalorder %s642_s30, %s635_s28 }
  0x63   : > { %p639_p13 = pneg %p638_p6  ;;  %p645_p0 = por %p644_p11, %p643_p2 }
  0x65   : > { %p646_p5 = pnand %p645_p0, %p639_p13 }
  0x67   : > { %649 = shalt.err (!%p646_p5)
}
  0x68   : > { %p1044_p7 = scmp.ne.s32.totalorder %s1038_s4, 0  ;;  %p1045_p3 = scmp.ne.s32.totalorder %s1043_s19, 0 }
  0x69   : > { %s952_s21 = sand.u32 (!%p1045_p3), 1, %s720_s13   ;;  %p1046_p0 = scmp.ne.s32.totalorder (!%p1045_p3), %s1035_s24, 0 }
  0x6a   : > { %495 = dma.hbm_to_vmem [thread:$0]  (!%p1044_p7), %s928_s5, 16, %s211_s23, %s853_s11  }
  0x6b   : > { %219 = sbr.rel (%p1045_p3) target bundleno = 292 (0x124), region = 32  ;;  %s468_s6 = sshll.u32 (!%p1045_p3), %s952_s21, 3 }
  0x6c   : > { %s222_s1 = scalar_lea.sflag (!%p1045_p3), [#allocation3], %s952_s21  ;;  %s225_s20 = scalar_lea.vmem (!%p1045_p3), [#allocation2], %s468_s6 }
  0x72   : > { %703 = dma.done.wait (%p1046_p0), %s222_s1, 128  }
  0x73   : > { %705 = vsyncadd (%p1046_p0), %s222_s1, 4294967168  ;;  %s230_s4 = sand.u32 1, %s795_s18   ;;  %s469_s11 = sshll.u32 %s952_s21, 1 }
  0x74   : > { %s231_s19 = scalar_lea.sflag [#allocation6], %s230_s4  ;;  %s234_s5 = scalar_lea.vmem [#allocation5], %s469_s11 }
  0x75   : > { %707 = dma.done.wait (%p1046_p0), %s231_s19, 48  }
  0x76   : > { %709 = vsyncadd (%p1046_p0), %s231_s19, 4294967248  ;;  %v741_v0 = vmov 0   ;;  %v274_v1 = vld [vmem:[%s225_s20] sm:$0xff]  ;;  %v742_v2 = vmov 1   ;;  %s242_s23 = scalar_lea.vmem [#allocation7], %s952_s21  ;;  %v315_v16 = vlaneseq  ;;  %s475_s18 = sshll.u32 %s728_s15, 7 }
  0x77   : > { %552 = vset.pattern.permute.xlu0 %v741_v0  ;;  %v306_v3 = vld [vmem:[%s242_s23] sm:$0x1]  ;;  %v471_v6 = vld [vmem:[%s234_s5] ss:$0 sm:$0xff]  ;;  %v472_v7 = vld [vmem:[%s234_s5 + $0x1] ss:$0 sm:$0xff]  ;;  %s975_s7 = scalar_lea.hbm %s1027_s3, %s475_s18 }
  0x78   : > { %283 = vperm.xlu0 %552, %v274_v1   ;;  %v473_v4 = vmul.f32 -1.442695, %v306_v3  ;;  %v316_v17 = vshrl.u32 %v315_v16, 7  ;;  %s273_s24 = scalar_lea.vmem [#allocation8], %s468_s6  ;;  %s323_s28 = scalar_lea.sflag [#allocation4], %s952_s21 }
  0x79   : > { %s337_s29 = sshll.u32 %s273_s24, 4  ;;  %p1047_p10 = scmp.ne.s32.totalorder %s1036_s25, 0  ;;  %s977_s29 = int_to_ptr.vmem [resolvable:$true] %s337_s29 }
  0x7a   : > { %554 = vpow2.f32 %v473_v4  ;;  %v317_v19 = vsub.s32 0, %v316_v17  ;;  %s650_s8 = scalar_lea.vmem %s977_s29, 128  ;;  %s743_s15 = smov [#allocation8]  }
  0x7b   : > { %p651_p4 = scmp.ne.s32.totalorder %s977_s29, %s650_s8  ;;  %s654_s22 = sshll.u32 %s743_s15, 4  ;;  %s655_s22 = int_to_ptr.vmem [resolvable:$false] %s654_s22 }
  0x7c   : > { %553 = vset.pattern.permute.xlu0 %v742_v2  ;;  %s656_s30 = scalar_lea.vmem %s655_s22, 256  ;;  %p657_p8 = scmp.lt.s32.totalorder %s977_s29, %s655_s22 }
  0x7d   : > { %292 = vperm.xlu0 %553, %v274_v1   ;;  %p652_p12 = pnand %p651_p4, %p1047_p10  ;;  %p658_p9 = scmp.lt.s32.totalorder %s656_s30, %s650_s8 }
  0x7f   : > { %p653_p1 = pneg %p652_p12  ;;  %p659_p6 = por %p658_p9, %p657_p8 }
  0x81   : > { %p660_p13 = pnand %p659_p6, %p653_p1 }
  0x84   : > { %v555_v8 = vpop.eup %554 }
  0x85   : > { %v310_v12 = vadd.f32 1.0, %v555_v8 }
  0x87   : > { %556 = vrcp.f32 %v310_v12 }
  0x91   : > { %v557_v18 = vpop.eup %556 }
  0x92   : > { %v318_v24 = vrot.slane %v557_v18, %v317_v19 }
  0xf7   : > { %v284_v5 = vpop.permute.xlu0 %283 }
  0xf8   : > { %v286_v9 = vsub.f32 %v471_v6, %v284_v5 }
  0xfa   : > { %v296_v13 = vmul.f32 %v286_v9, %v286_v9 }
  0xfc   : > { %v293_v10 = vpop.permute.xlu0 %292 }
  0xfd   : > { %v295_v11 = vsub.f32 %v472_v7, %v293_v10 }
  0xff   : > { %v297_v14 = vmul.f32 %v295_v11, %v295_v11 }
 0x101   : > { %v298_v15 = vadd.f32 %v297_v14, %v296_v13 }
 0x103   : > { %558 = vrsqrt.f32 %v298_v15  ;;  %vm301_vm0 = vcmp.eq.f32.partialorder %v298_v15, inf  ;;  %v304_v22 = vand.u32 2147483648, %v298_v15  ;;  %vm303_vm1 = vcmp.eq.f32.partialorder %v298_v15, 0.0 }
 0x10d   : > { %v559_v20 = vpop.eup %558 }
 0x10e   : > { %v300_v21 = vmul.f32 %v559_v20, %v298_v15 }
 0x110   : > { %v302_v23 = vsel %vm301_vm0, %v298_v15, %v300_v21 }
 0x111   : > { %v305_v25 = vsel %vm303_vm1, %v304_v22, %v302_v23 }
 0x112   : > { %v313_v26 = vmul.f32 0.05, %v305_v25 }
 0x114   : > { %v320_v27 = vsub.f32 %v313_v26, %v318_v24 }
 0x116   : > { %321 = vst [vmem:[%s273_s24] sm:$0xff] %v320_v27 }
 0x117   : > { %663 = shalt.err (!%p660_p13)
}
 0x118   : > { %s664_s21 = scalar_lea.hbm %s975_s7, 128  ;;  %s668_s20 = scalar_lea.hbm %s1027_s3, 256 }
 0x119   : > { %p665_p2 = scmp.ne.s32.totalorder %s975_s7, %s664_s21  ;;  %p669_p7 = scmp.lt.u32.totalorder %s975_s7, %s1027_s3 }
 0x11a   : > { %p670_p3 = scmp.lt.u32.totalorder %s668_s20, %s664_s21  ;;  %p672_p4 = scmp.lt.u32.totalorder %s664_s21, %s975_s7 }
 0x11b   : > { %p666_p11 = pnand %p665_p2, %p1047_p10 }
 0x11c   : > { %p671_p0 = por %p670_p3, %p669_p7 }
 0x11d   : > { %p667_p5 = pneg %p666_p11 }
 0x11e   : > { %p673_p12 = por %p672_p4, %p671_p0 }
 0x120   : > { %p674_p1 = pnand %p673_p12, %p667_p5 }
 0x122   : > { %677 = shalt.err (!%p674_p1)
}
 0x123   : > { %484 = dma.vmem_to_hbm [thread:$0]  (%p1047_p10), %s977_s29, 128, %s975_s7, %s323_s28  }
 0x124 PF: > { %s349_s19 = sand.u32 1, %s716_s12   ;;  %p1048_p8 = scmp.ne.s32.totalorder %s1037_s27, 0 }
 0x125   : > { %p1049_p9 = scmp.ge.s32.totalorder %s736_s17, 2  ;;  %s350_s5 = scalar_lea.sflag [#allocation4], %s349_s19 }
 0x127   : > { %p497_p6 = pnand %p1049_p9, %p1048_p8 }
 0x129   : > { %711 = dma.done.wait (!%p497_p6), %s350_s5, 128  }
 0x12a   : > { %713 = vsyncadd (!%p497_p6), %s350_s5, 4294967168  ;;  %s22_s17 = sadd.s32 1, %s736_s17   ;;  %s1050_s25 = sld [smem:[#allocation12_spill]] }
 0x12b   : > { %p19_p13 = scmp.ge.s32.totalorder %s22_s17, 4   ;;  %s1051_s12 = smov %s720_s13 }
 0x12c   : > { %s1052_s13 = smov %s724_s14  ;;  %s1053_s14 = smov %s824_s26 }
 0x12d   : > { %s1054_s15 = smov %s732_s16  ;;  %21 = sbr.rel (!%p19_p13) target bundleno = 10 (0xa), region = 101 }
 0x130   : > { %s1055_s16 = smov %s1050_s25 }
 0x134   :  { %355 = vsyncpa [#allocation3], 1 }
 0x135   :  { %357 = vsyncpa [#allocation3 + $0x1], 1 }
 0x136   :  { %358 = vsyncpa [#allocation6], 1 }
 0x137   :  { %360 = vsyncpa [#allocation6 + $0x1], 1 }
 0x138   :  { %361 = vsyncpa [#allocation4], 1 }
 0x139   :  { %363 = vsyncpa [#allocation4 + $0x1], 1 }

</bundles_post_ra>
